<compile_context>
chip_gen: v7x
topology: tpu7x:2x2x1
jax: 0.10.0
libtpu: 0.0.40
codegen_flags: <defaults>
</compile_context>

<pallas_src>
import functools

import jax
import jax.numpy as jnp
from jax.experimental import pallas as pl
from jax.experimental.pallas import tpu as pltpu

_LANE = 128   # lane width: every feature dim is padded to a multiple of this
_SUB = 8      # sublane granularity for the batch tile


def _round_up(n, m):
    return ((n + m - 1) // m) * m


def _fnn_fused_kernel(*refs, num_layers, compute_dtype):
    """Fused MLP body.

    refs = (x_ref, w0, b0, w1, b1, ..., w_{n-1}, b_{n-1}, o_ref)
    Computes relu(((x @ w0 + b0) @ w1 + b1) ... @ w_{n-1} + b_{n-1}),
    matching the PyTorch FNN (no inter-layer activation, ReLU only at the end).
    Matmul operands are `compute_dtype` (bf16 on the fast path), accumulation
    and bias-add are f32.
    """
    x_ref = refs[0]
    o_ref = refs[-1]

    h = x_ref[...]
    if h.dtype != compute_dtype:
        h = h.astype(compute_dtype)

    acc = None
    for i in range(num_layers):
        w = refs[1 + 2 * i][...]
        b = refs[2 + 2 * i][...]
        acc = jnp.dot(h, w, preferred_element_type=jnp.float32)
        acc = acc + b.astype(jnp.float32)
        if i + 1 < num_layers:
            h = acc.astype(compute_dtype)

    o_ref[...] = jnp.maximum(acc, 0.0).astype(o_ref.dtype)


def prepare_fnn_params(params, *, compute_dtype=jnp.bfloat16):
    """One-time parameter prep (do NOT call per forward pass).

    Zero-pads every feature dim to a multiple of 128 (lane-dense tiles, exact
    for a pure linear chain) and casts weights to the MXU compute dtype.
    Biases stay f32 (they are added to the f32 accumulator).

    params: list of (w, b) with w as (fan_in, fan_out) — the transpose of
            torch.nn.Linear.weight — and b as (fan_out,).
    Returns (padded_params, dims) where dims are the original layer widths.
    """
    dims = [params[0][0].shape[0]] + [w.shape[1] for w, _ in params]
    pdims = [_round_up(d, _LANE) for d in dims]
    padded = []
    for i, (w, b) in enumerate(params):
        fi, fo = w.shape
        wp = jnp.zeros((pdims[i], pdims[i + 1]), compute_dtype)
        wp = wp.at[:fi, :fo].set(w.astype(compute_dtype))
        bp = jnp.zeros((1, pdims[i + 1]), jnp.float32)
        bp = bp.at[0, :fo].set(b.astype(jnp.float32))
        padded.append((wp, bp))
    return padded, dims


def fnn_forward(padded_params, x, *, out_features, block_batch=512,
                return_padded=False):
    """Fused forward pass.  `padded_params` comes from prepare_fnn_params."""
    num_layers = len(padded_params)
    batch, in_features = x.shape
    pdims = [padded_params[0][0].shape[0]] + \
            [w.shape[1] for w, _ in padded_params]
    compute_dtype = padded_params[0][0].dtype
    assert in_features <= pdims[0], "x features exceed prepared weight fan_in"

    # --- batch tiling --------------------------------------------------------
    bb = min(block_batch, _round_up(batch, _SUB))
    # v7x megacore: make sure large batches produce >=2 grid tiles so both
    # TensorCores get work (skipped for small batches where it only adds
    # per-step overhead on single-TC chips).
    if bb >= batch and batch >= 512:
        bb = _round_up((batch + 1) // 2, _SUB)

    # --- VMEM budget (per-core, conservative for v7x's 64 MiB) ---------------
    def est_vmem(bb_):
        w_bytes = sum(int(w.size) * w.dtype.itemsize + int(b.size) * 4
                      for w, b in padded_params)
        act = bb_ * pdims[0] * jnp.dtype(x.dtype).itemsize \
            + bb_ * pdims[-1] * jnp.dtype(x.dtype).itemsize
        tmp = bb_ * max(pdims) * (4 + compute_dtype.itemsize)  # acc + bf16 copy
        # x2: resident weights and activation tiles are double-buffered.
        return 2 * w_bytes + 2 * act + tmp

    budget = 48 << 20
    while est_vmem(bb) > budget and bb > _SUB:
        bb = max(_SUB, _round_up(bb // 2, _SUB))
    # TODO(synk): if the weights alone exceed the budget (e.g. 4096x4096 f32
    # layers) stream weight tiles over an extra N/K grid axis instead of
    # keeping them fully VMEM-resident.
    vmem_limit = min(max(int(est_vmem(bb) * 1.5), 32 << 20), 64 << 20)

    grid = (pl.cdiv(batch, bb),)   # partial trailing tile is fine

    # --- input: pad/cast only when actually needed ----------------------------
    if in_features != pdims[0]:
        xk = jnp.zeros((batch, pdims[0]), compute_dtype)
        xk = xk.at[:, :in_features].set(x.astype(compute_dtype))
    else:
        xk = x   # already lane-aligned; the kernel casts the tile in VMEM

    kernel = functools.partial(_fnn_fused_kernel, num_layers=num_layers,
                               compute_dtype=compute_dtype)

    # Input specs: activation tile strides over batch; weights/biases resident.
    in_specs = [pl.BlockSpec((bb, pdims[0]), lambda i: (i, 0))]
    flat_params = []
    for li, (w, b) in enumerate(padded_params):
        in_specs.append(
            pl.BlockSpec((pdims[li], pdims[li + 1]), lambda i: (0, 0)))
        in_specs.append(
            pl.BlockSpec((1, pdims[li + 1]), lambda i: (0, 0)))
        flat_params += [w, b]
    out_spec = pl.BlockSpec((bb, pdims[-1]), lambda i: (i, 0))

    out_padded = pl.pallas_call(
        kernel,
        out_shape=jax.ShapeDtypeStruct((batch, pdims[-1]), x.dtype),
        grid_spec=pl.GridSpec(grid=grid, in_specs=in_specs, out_specs=out_spec),
        compiler_params=pltpu.CompilerParams(
            dimension_semantics=("parallel",),
            vmem_limit_bytes=vmem_limit,
        ),
    )(xk, *flat_params)

    if return_padded or out_features == pdims[-1]:
        return out_padded
    return out_padded[:, :out_features]


def init_fnn_params(key, in_features, out_features, layer_num, node_num):
    """Deterministic init matching the FNN layer structure.

    Layer sizes: in_features -> node_num -> ... (layer_num layers) ->
    out_features.  Weights stored as (fan_in, fan_out) = transpose of
    torch.nn.Linear.weight.  Init mimics PyTorch default:
    U(-1/sqrt(fan_in), 1/sqrt(fan_in)).
    """
    dims = [in_features] + [node_num] * layer_num + [out_features]
    params = []
    for fan_in, fan_out in zip(dims[:-1], dims[1:]):
        key, kw, kb = jax.random.split(key, 3)
        bound = 1.0 / jnp.sqrt(float(fan_in))
        w = jax.random.uniform(kw, (fan_in, fan_out), jnp.float32, -bound, bound)
        b = jax.random.uniform(kb, (fan_out,), jnp.float32, -bound, bound)
        params.append((w, b))
    return params


def fnn_reference(params, x):
    """Pure-JAX reference (matches the PyTorch FNN.forward)."""
    for w, b in params:
        x = x @ w + b
    return jnp.maximum(x, 0.0)


if __name__ == "__main__":
    # Small shapes consistent with the module.
    in_features = 16
    out_features = 8
    layer_num = 2        # -> 3 Linear layers: 16->32, 32->32, 32->8
    node_num = 32
    batch = 8

    key = jax.random.PRNGKey(0)
    kx, kp = jax.random.split(key)
    x = jax.random.normal(kx, (batch, in_features), jnp.float32)
    params = init_fnn_params(kp, in_features, out_features, layer_num, node_num)
    ref = fnn_reference(params, x)

    # Fast path: bf16 MXU operands, f32 accumulation.
    prep_bf16, _ = prepare_fnn_params(params, compute_dtype=jnp.bfloat16)
    out_bf16 = jax.block_until_ready(
        fnn_forward(prep_bf16, x, out_features=out_features))
    assert out_bf16.shape == (batch, out_features)
    assert jnp.allclose(out_bf16, ref, atol=5e-2, rtol=5e-2)

    # Exactness check: f32 operands (verification only; slower MXU path).
    prep_f32, _ = prepare_fnn_params(params, compute_dtype=jnp.float32)
    out_f32 = jax.block_until_ready(
        fnn_forward(prep_f32, x, out_features=out_features))
    assert out_f32.shape == (batch, out_features)
    assert jnp.allclose(out_f32, ref, atol=1e-5, rtol=1e-5)

    print("KERNEL_OK")
</pallas_src>

<mosaic_0001>
module attributes {stable_mosaic.version = 11 : i64} {
  func.func @_fnn_fused_kernel(%arg0: i32, %arg1: memref<8x128xbf16, #tpu.memory_space<vmem>>, %arg2: memref<128x128xbf16, #tpu.memory_space<vmem>>, %arg3: memref<1x128xf32, #tpu.memory_space<vmem>>, %arg4: memref<128x128xbf16, #tpu.memory_space<vmem>>, %arg5: memref<1x128xf32, #tpu.memory_space<vmem>>, %arg6: memref<128x128xbf16, #tpu.memory_space<vmem>>, %arg7: memref<1x128xf32, #tpu.memory_space<vmem>>, %arg8: memref<8x128xf32, #tpu.memory_space<vmem>>) attributes {dimension_semantics = [#tpu.dimension_semantics<parallel>], iteration_bounds = array<i64: 1>, scalar_prefetch = 0 : i64, scratch_operands = 0 : i64, tpu.core_type = #tpu.core_type<tc>, window_params = [{transform_indices = @transform_0, window_bounds = array<i64: 8, 128>}, {pipeline_mode = #tpu.pipeline_mode<synchronous>, transform_indices = @transform_1, window_bounds = array<i64: 128, 128>}, {pipeline_mode = #tpu.pipeline_mode<synchronous>, transform_indices = @transform_2, window_bounds = array<i64: 1, 128>}, {pipeline_mode = #tpu.pipeline_mode<synchronous>, transform_indices = @transform_3, window_bounds = array<i64: 128, 128>}, {pipeline_mode = #tpu.pipeline_mode<synchronous>, transform_indices = @transform_4, window_bounds = array<i64: 1, 128>}, {pipeline_mode = #tpu.pipeline_mode<synchronous>, transform_indices = @transform_5, window_bounds = array<i64: 128, 128>}, {pipeline_mode = #tpu.pipeline_mode<synchronous>, transform_indices = @transform_6, window_bounds = array<i64: 1, 128>}, {transform_indices = @transform_7, window_bounds = array<i64: 8, 128>}]} {
    %c0 = arith.constant 0 : index
    %c0_0 = arith.constant 0 : index
    %0 = vector.load %arg1[%c0, %c0_0] : memref<8x128xbf16, #tpu.memory_space<vmem>>, vector<8x128xbf16>
    %c0_1 = arith.constant 0 : index
    %c0_2 = arith.constant 0 : index
    %1 = vector.load %arg2[%c0_1, %c0_2] : memref<128x128xbf16, #tpu.memory_space<vmem>>, vector<128x128xbf16>
    %c0_3 = arith.constant 0 : index
    %c0_4 = arith.constant 0 : index
    %2 = vector.load %arg3[%c0_3, %c0_4] : memref<1x128xf32, #tpu.memory_space<vmem>>, vector<1x128xf32>
    %cst = arith.constant dense<0.000000e+00> : vector<8x128xf32>
    %3 = tpu.matmul %0, %1, %cst {dimension_numbers = #tpu.dot_dimension_numbers<[1], [0], [0], [1], [0, 0, 1, 1], [], []>} : vector<8x128xbf16>, vector<128x128xbf16>, vector<8x128xf32> -> vector<8x128xf32>
    %4 = vector.broadcast %2 : vector<1x128xf32> to vector<8x128xf32>
    %5 = arith.addf %3, %4 : vector<8x128xf32>
    %6 = arith.truncf %5 : vector<8x128xf32> to vector<8x128xbf16>
    %c0_5 = arith.constant 0 : index
    %c0_6 = arith.constant 0 : index
    %7 = vector.load %arg4[%c0_5, %c0_6] : memref<128x128xbf16, #tpu.memory_space<vmem>>, vector<128x128xbf16>
    %c0_7 = arith.constant 0 : index
    %c0_8 = arith.constant 0 : index
    %8 = vector.load %arg5[%c0_7, %c0_8] : memref<1x128xf32, #tpu.memory_space<vmem>>, vector<1x128xf32>
    %cst_9 = arith.constant dense<0.000000e+00> : vector<8x128xf32>
    %9 = tpu.matmul %6, %7, %cst_9 {dimension_numbers = #tpu.dot_dimension_numbers<[1], [0], [0], [1], [0, 0, 1, 1], [], []>} : vector<8x128xbf16>, vector<128x128xbf16>, vector<8x128xf32> -> vector<8x128xf32>
    %10 = vector.broadcast %8 : vector<1x128xf32> to vector<8x128xf32>
    %11 = arith.addf %9, %10 : vector<8x128xf32>
    %12 = arith.truncf %11 : vector<8x128xf32> to vector<8x128xbf16>
    %c0_10 = arith.constant 0 : index
    %c0_11 = arith.constant 0 : index
    %13 = vector.load %arg6[%c0_10, %c0_11] : memref<128x128xbf16, #tpu.memory_space<vmem>>, vector<128x128xbf16>
    %c0_12 = arith.constant 0 : index
    %c0_13 = arith.constant 0 : index
    %14 = vector.load %arg7[%c0_12, %c0_13] : memref<1x128xf32, #tpu.memory_space<vmem>>, vector<1x128xf32>
    %cst_14 = arith.constant dense<0.000000e+00> : vector<8x128xf32>
    %15 = tpu.matmul %12, %13, %cst_14 {dimension_numbers = #tpu.dot_dimension_numbers<[1], [0], [0], [1], [0, 0, 1, 1], [], []>} : vector<8x128xbf16>, vector<128x128xbf16>, vector<8x128xf32> -> vector<8x128xf32>
    %16 = vector.broadcast %14 : vector<1x128xf32> to vector<8x128xf32>
    %17 = arith.addf %15, %16 : vector<8x128xf32>
    %cst_15 = arith.constant 0.000000e+00 : f32
    %18 = vector.broadcast %cst_15 : f32 to vector<8x128xf32>
    %19 = arith.maximumf %17, %18 : vector<8x128xf32>
    %c0_16 = arith.constant 0 : index
    %c0_17 = arith.constant 0 : index
    %20 = vector.load %arg8[%c0_16, %c0_17] : memref<8x128xf32, #tpu.memory_space<vmem>>, vector<8x128xf32>
    tpu.vector_store %arg8[%c0_16, %c0_17], %19 {strides = array<i32>} : memref<8x128xf32, #tpu.memory_space<vmem>>, vector<8x128xf32>,
    return
  }
  func.func @transform_0(%arg0: i32) -> (i32, i32) {
    %c0_i32 = arith.constant 0 : i32
    %c0_i32_0 = arith.constant 0 : i32
    return %arg0, %c0_i32 : i32, i32
  }
  func.func @transform_1(%arg0: i32) -> (i32, i32) {
    %c0_i32 = arith.constant 0 : i32
    %c0_i32_0 = arith.constant 0 : i32
    %c0_i32_1 = arith.constant 0 : i32
    return %c0_i32, %c0_i32_0 : i32, i32
  }
  func.func @transform_2(%arg0: i32) -> (i32, i32) {
    %c0_i32 = arith.constant 0 : i32
    %c0_i32_0 = arith.constant 0 : i32
    %c0_i32_1 = arith.constant 0 : i32
    return %c0_i32, %c0_i32_0 : i32, i32
  }
  func.func @transform_3(%arg0: i32) -> (i32, i32) {
    %c0_i32 = arith.constant 0 : i32
    %c0_i32_0 = arith.constant 0 : i32
    %c0_i32_1 = arith.constant 0 : i32
    return %c0_i32, %c0_i32_0 : i32, i32
  }
  func.func @transform_4(%arg0: i32) -> (i32, i32) {
    %c0_i32 = arith.constant 0 : i32
    %c0_i32_0 = arith.constant 0 : i32
    %c0_i32_1 = arith.constant 0 : i32
    return %c0_i32, %c0_i32_0 : i32, i32
  }
  func.func @transform_5(%arg0: i32) -> (i32, i32) {
    %c0_i32 = arith.constant 0 : i32
    %c0_i32_0 = arith.constant 0 : i32
    %c0_i32_1 = arith.constant 0 : i32
    return %c0_i32, %c0_i32_0 : i32, i32
  }
  func.func @transform_6(%arg0: i32) -> (i32, i32) {
    %c0_i32 = arith.constant 0 : i32
    %c0_i32_0 = arith.constant 0 : i32
    %c0_i32_1 = arith.constant 0 : i32
    return %c0_i32, %c0_i32_0 : i32, i32
  }
  func.func @transform_7(%arg0: i32) -> (i32, i32) {
    %c0_i32 = arith.constant 0 : i32
    %c0_i32_0 = arith.constant 0 : i32
    return %arg0, %c0_i32 : i32, i32
  }
}

</mosaic_0001>

<bundles_post_ra>
// kernel: tpu_custom_call.1
= control target key start
LH: loop header
LB: loop body
LE: loop exit
PB: predicated region body
PF: predicated region fallthrough
CT: control target
= control target key end

     0   :  { %12 = vsyncpa [#allocation3], 0  ;;  %s858_s0 = inlined_call_operand.hbm [shape: bf16[8,128], index: 0, kind: input, shape index: {}]   ;;  %s859_s1 = inlined_call_operand.hbm [shape: bf16[128,128], index: 1, kind: input, shape index: {}]   ;;  %s860_s2 = inlined_call_operand.vmem [shape: f32[1,128], index: 2, kind: input, shape index: {}]   ;;  %s861_s3 = inlined_call_operand.hbm [shape: bf16[128,128], index: 3, kind: input, shape index: {}]   ;;  %s862_s4 = inlined_call_operand.vmem [shape: f32[1,128], index: 4, kind: input, shape index: {}]   ;;  %s863_s5 = inlined_call_operand.hbm [shape: bf16[128,128], index: 5, kind: input, shape index: {}]   ;;  %s864_s6 = inlined_call_operand.vmem [shape: f32[1,128], index: 6, kind: input, shape index: {}]   ;;  %s865_s7 = inlined_call_operand.hbm [shape: f32[8,128], index: 7, kind: output, shape index: {}]  }
   0x1   :  { %13 = vsyncpa [#allocation6], 0 }
   0x2   :  { %14 = vsyncpa [#allocation9], 0 }
   0x3   :  { %15 = vsyncpa [#allocation4], 0  ;;  %s701_s24 = smov [#allocation5]   ;;  %s583_s28 = scalar_lea.hbm %s859_s1, 1024 }
   0x4   :  { %s31_s25 = sshll.u32 %s701_s24, 4  ;;  %p584_p0 = scmp.ne.s32.totalorder %s859_s1, %s583_s28  ;;  %s32_s25 = int_to_ptr.vmem [resolvable:$true] %s31_s25 }
   0x5   :  { %p587_p1 = scmp.lt.u32.totalorder %s583_s28, %s859_s1 }
   0x7   :  { %p589_p2 = pnand %p587_p1, %p584_p0 }
   0x9   :  { %592 = shalt.err (!%p589_p2)
}
   0xa   :  { %s593_s10 = scalar_lea.vmem %s32_s25, 1024  ;;  %p598_p4 = scmp.lt.s32.totalorder %s32_s25, %s32_s25 }
   0xb   :  { %p594_p3 = scmp.ne.s32.totalorder %s32_s25, %s593_s10  ;;  %p599_p5 = scmp.lt.s32.totalorder %s593_s10, %s593_s10 }
   0xd   :  { %p600_p6 = por %p599_p5, %p598_p4 }
   0xf   :  { %p601_p7 = pnand %p600_p6, %p594_p3 }
  0x11   :  { %604 = shalt.err (!%p601_p7)
}
  0x12   :  { %s702_s11 = smov 64   ;;  %s703_s12 = smov 4  }
  0x13   :  { %37 = dma.hbm_to_vmem [thread:$0]  %s859_s1, 1024, %s32_s25, [#allocation6], %s702_s11, %s702_s11, %s703_s12  }
  0x14   :  { %s704_s15 = smov [#allocation2]   ;;  %s705_s17 = smov [#allocation7]  }
  0x15   :  { %s22_s16 = sshll.u32 %s704_s15, 4  ;;  %s45_s18 = sshll.u32 %s705_s17, 4  ;;  %s23_s16 = int_to_ptr.vmem [resolvable:$true] %s22_s16  ;;  %s46_s18 = int_to_ptr.vmem [resolvable:$true] %s45_s18 }
  0x16   :  { %s605_s21 = scalar_lea.hbm %s858_s0, 64 }
  0x17   :  { %p606_p8 = scmp.ne.s32.totalorder %s858_s0, %s605_s21  ;;  %p609_p9 = scmp.lt.u32.totalorder %s605_s21, %s858_s0 }
  0x19   :  { %p611_p10 = pnand %p609_p9, %p606_p8 }
  0x1b   :  { %614 = shalt.err (!%p611_p10)
}
  0x1c   :  { %s615_s1 = scalar_lea.vmem %s23_s16, 64  ;;  %p620_p12 = scmp.lt.s32.totalorder %s23_s16, %s23_s16 }
  0x1d   :  { %p616_p11 = scmp.ne.s32.totalorder %s23_s16, %s615_s1  ;;  %p621_p13 = scmp.lt.s32.totalorder %s615_s1, %s615_s1 }
  0x1f   :  { %p622_p0 = por %p621_p13, %p620_p12 }
  0x21   :  { %p623_p1 = pnand %p622_p0, %p616_p11 }
  0x23   :  { %626 = shalt.err (!%p623_p1)
}
  0x24   :  { %25 = dma.hbm_to_vmem [thread:$0]  %s858_s0, 64, %s23_s16, [#allocation3]  }
  0x25   :  { %s627_s30 = scalar_lea.hbm %s861_s3, 1024 }
  0x26   :  { %p628_p2 = scmp.ne.s32.totalorder %s861_s3, %s627_s30  ;;  %p631_p3 = scmp.lt.u32.totalorder %s627_s30, %s861_s3 }
  0x28   :  { %p633_p4 = pnand %p631_p3, %p628_p2 }
  0x2a   :  { %636 = shalt.err (!%p633_p4)
}
  0x2b   :  { %s637_s14 = scalar_lea.vmem %s46_s18, 1024  ;;  %p642_p6 = scmp.lt.s32.totalorder %s46_s18, %s46_s18 }
  0x2c   :  { %p638_p5 = scmp.ne.s32.totalorder %s46_s18, %s637_s14  ;;  %p643_p7 = scmp.lt.s32.totalorder %s637_s14, %s637_s14 }
  0x2e   :  { %p644_p8 = por %p643_p7, %p642_p6 }
  0x30   :  { %p645_p9 = pnand %p644_p8, %p638_p5 }
  0x32   :  { %648 = shalt.err (!%p645_p9)
}
  0x33   :  { %51 = dma.hbm_to_vmem [thread:$0]  %s861_s3, 1024, %s46_s18, [#allocation6], %s702_s11, %s702_s11, %s703_s12  }
  0x34   :  { %s706_s16 = smov [#allocation8]   ;;  %s649_s21 = scalar_lea.hbm %s863_s5, 1024 }
  0x35   :  { %s59_s17 = sshll.u32 %s706_s16, 4  ;;  %p650_p10 = scmp.ne.s32.totalorder %s863_s5, %s649_s21  ;;  %s60_s17 = int_to_ptr.vmem [resolvable:$true] %s59_s17 }
  0x36   :  { %p653_p11 = scmp.lt.u32.totalorder %s649_s21, %s863_s5 }
  0x38   :  { %p655_p12 = pnand %p653_p11, %p650_p10 }
  0x3a   :  { %658 = shalt.err (!%p655_p12)
}
  0x3b   :  { %s659_s1 = scalar_lea.vmem %s60_s17, 1024  ;;  %p664_p0 = scmp.lt.s32.totalorder %s60_s17, %s60_s17 }
  0x3c   :  { %p660_p13 = scmp.ne.s32.totalorder %s60_s17, %s659_s1  ;;  %p665_p1 = scmp.lt.s32.totalorder %s659_s1, %s659_s1 }
  0x3e   :  { %p666_p2 = por %p665_p1, %p664_p0 }
  0x40   :  { %p667_p3 = pnand %p666_p2, %p660_p13 }
  0x42   :  { %670 = shalt.err (!%p667_p3)
}
  0x43   :  { %65 = dma.hbm_to_vmem [thread:$0]  %s863_s5, 1024, %s60_s17, [#allocation9], %s702_s11, %s702_s11, %s703_s12  }
  0x44   :  { %693 = dma.done.wait [#allocation3], 64  }
  0x45   :  { %694 = vsyncadd [#allocation3], 4294967232 }
  0x46   :  { %695 = dma.done.wait [#allocation6], 2048  }
  0x47   :  { %696 = vsyncadd [#allocation6], 4294965248 }
  0x48   :  { %697 = dma.done.wait [#allocation9], 1024  }
  0x49   :  { %698 = vsyncadd [#allocation9], 4294966272  ;;  %v707_v0 = vmov 0.0   ;;  %vm708_vm0 = vmmov 0   ;;  %v559_v1 = vld [vmem:[#allocation5] sm:$0xff]   ;;  %v560_v2 = vld [vmem:[#allocation5 + $0x8] sm:$0xff]  }
  0x4a   :  { %490 = vmatprep.subr.bf16.mxu0 %v707_v0  ;;  %506 = vmatprep.mubr.msk.bf16.mxu0 %vm708_vm0, %v707_v0  ;;  %v561_v3 = vld [vmem:[#allocation5 + $0x10] sm:$0xff]   ;;  %v567_v4 = vld [vmem:[#allocation7] sm:$0xff]   ;;  %v562_v5 = vld [vmem:[#allocation5 + $0x18] sm:$0xff]   ;;  %s709_s28 = smov [#allocation10]  }
  0x4b   :  { %510 = vmatprep.subr.bf16.mxu1 %v707_v0  ;;  %526 = vmatprep.mubr.msk.bf16.mxu1 %vm708_vm0, %v707_v0  ;;  %v568_v6 = vld [vmem:[#allocation7 + $0x8] sm:$0xff]   ;;  %v563_v7 = vld [vmem:[#allocation5 + $0x20] sm:$0xff]   ;;  %v569_v8 = vld [vmem:[#allocation7 + $0x10] sm:$0xff]   ;;  %s425_s29 = sshll.u32 %s709_s28, 4  ;;  %s426_s29 = int_to_ptr.vmem [resolvable:$true] %s425_s29 }
  0x4c   :  { %491 = vmatpush3.bf16.msra.mxu0 %v559_v1  ;;  %511 = vmatpush3.bf16.msra.mxu1 %v567_v4  ;;  %v564_v9 = vld [vmem:[#allocation5 + $0x28] sm:$0xff]   ;;  %v570_v10 = vld [vmem:[#allocation7 + $0x18] sm:$0xff]   ;;  %v565_v11 = vld [vmem:[#allocation5 + $0x30] sm:$0xff]   ;;  %p676_p5 = scmp.lt.s32.totalorder %s426_s29, %s426_s29 }
  0x4d   :  { %492 = vmatprep.subr.bf16.mxu0 %v707_v0  ;;  %512 = vmatprep.subr.bf16.mxu1 %v707_v0  ;;  %v571_v12 = vld [vmem:[#allocation7 + $0x20] sm:$0xff]   ;;  %v566_v13 = vld [vmem:[#allocation5 + $0x38] sm:$0xff]   ;;  %v572_v14 = vld [vmem:[#allocation7 + $0x28] sm:$0xff]  }
  0x4e   :  { %v81_v15 = vld [vmem:[#allocation2] sm:$0xf]  ;;  %v573_v16 = vld [vmem:[#allocation7 + $0x30] sm:$0xff]   ;;  %v575_v18 = vld [vmem:[#allocation8] sm:$0xff]  }
  0x4f   :  { %v574_v17 = vld [vmem:[#allocation7 + $0x38] sm:$0xff]   ;;  %v576_v19 = vld [vmem:[#allocation8 + $0x8] sm:$0xff]   ;;  %v577_v20 = vld [vmem:[#allocation8 + $0x10] sm:$0xff]  }
  0x50   :  { %493 = vmatpush3.bf16.msra.mxu0 %v560_v2  ;;  %513 = vmatpush3.bf16.msra.mxu1 %v568_v6  ;;  %v578_v21 = vld [vmem:[#allocation8 + $0x18] sm:$0xff]   ;;  %v579_v22 = vld [vmem:[#allocation8 + $0x20] sm:$0xff]   ;;  %v580_v23 = vld [vmem:[#allocation8 + $0x28] sm:$0xff]  }
  0x51   :  { %494 = vmatprep.subr.bf16.mxu0 %v707_v0  ;;  %514 = vmatprep.subr.bf16.mxu1 %v707_v0  ;;  %v581_v24 = vld [vmem:[#allocation8 + $0x30] sm:$0xff]   ;;  %v436_v25 = vld [vmem:[%s860_s2] ss:$0 sm:$0xff] }
  0x52   :  { %v582_v32 = vld [vmem:[#allocation8 + $0x38] sm:$0xff]  }
  0x53   :  { %v445_v33 = vld [vmem:[%s862_s4] ss:$0 sm:$0xff]  ;;  %s671_s4 = scalar_lea.vmem %s426_s29, 128 }
  0x54   :  { %495 = vmatpush3.bf16.msra.mxu0 %v561_v3  ;;  %515 = vmatpush3.bf16.msra.mxu1 %v569_v8  ;;  %v454_v40 = vld [vmem:[%s864_s6] ss:$0 sm:$0xff]  ;;  %p672_p4 = scmp.ne.s32.totalorder %s426_s29, %s671_s4  ;;  %p677_p6 = scmp.lt.s32.totalorder %s671_s4, %s671_s4 }
  0x55   :  { %496 = vmatprep.subr.bf16.mxu0 %v707_v0  ;;  %516 = vmatprep.subr.bf16.mxu1 %v707_v0 }
  0x56   :  { %p678_p7 = por %p677_p6, %p676_p5 }
  0x58   :  { %497 = vmatpush3.bf16.msra.mxu0 %v562_v5  ;;  %517 = vmatpush3.bf16.msra.mxu1 %v570_v10  ;;  %p679_p8 = pnand %p678_p7, %p672_p4 }
  0x59   :  { %498 = vmatprep.subr.bf16.mxu0 %v707_v0  ;;  %518 = vmatprep.subr.bf16.mxu1 %v707_v0 }
  0x5c   :  { %499 = vmatpush3.bf16.msra.mxu0 %v563_v7  ;;  %519 = vmatpush3.bf16.msra.mxu1 %v571_v12 }
  0x5d   :  { %500 = vmatprep.subr.bf16.mxu0 %v707_v0  ;;  %520 = vmatprep.subr.bf16.mxu1 %v707_v0 }
  0x60   :  { %501 = vmatpush3.bf16.msra.mxu0 %v564_v9  ;;  %521 = vmatpush3.bf16.msra.mxu1 %v572_v14 }
  0x61   :  { %502 = vmatprep.subr.bf16.mxu0 %v707_v0  ;;  %522 = vmatprep.subr.bf16.mxu1 %v707_v0 }
  0x64   :  { %503 = vmatpush3.bf16.msra.mxu0 %v565_v11  ;;  %523 = vmatpush3.bf16.msra.mxu1 %v573_v16 }
  0x65   :  { %504 = vmatprep.subr.bf16.mxu0 %v707_v0  ;;  %524 = vmatprep.subr.bf16.mxu1 %v707_v0 }
  0x68   :  { %505 = vmatpush3.bf16.msra.mxu0 %v566_v13  ;;  %525 = vmatpush3.bf16.msra.mxu1 %v574_v17 }
  0x69   :  { %530 = vmatprep.subr.bf16.mxu0 %v707_v0 }
  0x6b   :  { %507 = vmatmul.mubr.bf16.vlgmr.msra.gmra.mrb[0].mxu0 %v81_v15 }
  0x6c   :  { %546 = vmatprep.mubr.msk.bf16.mxu0 %vm708_vm0, %v707_v0  ;;  %531 = vmatpush3.bf16.msra.mxu0 %v575_v18 }
  0x6d   :  { %532 = vmatprep.subr.bf16.mxu0 %v707_v0 }
  0x70   :  { %533 = vmatpush3.bf16.msra.mxu0 %v576_v19 }
  0x71   :  { %534 = vmatprep.subr.bf16.mxu0 %v707_v0 }
  0x74   :  { %535 = vmatpush3.bf16.msra.mxu0 %v577_v20 }
  0x75   :  { %536 = vmatprep.subr.bf16.mxu0 %v707_v0 }
  0x78   :  { %537 = vmatpush3.bf16.msra.mxu0 %v578_v21 }
  0x79   :  { %538 = vmatprep.subr.bf16.mxu0 %v707_v0 }
  0x7c   :  { %539 = vmatpush3.bf16.msra.mxu0 %v579_v22 }
  0x7d   :  { %540 = vmatprep.subr.bf16.mxu0 %v707_v0 }
  0x80   :  { %541 = vmatpush3.bf16.msra.mxu0 %v580_v23 }
  0x81   :  { %542 = vmatprep.subr.bf16.mxu0 %v707_v0 }
  0x84   :  { %543 = vmatpush3.bf16.msra.mxu0 %v581_v24 }
  0x85   :  { %544 = vmatprep.subr.bf16.mxu0 %v707_v0 }
  0x88   :  { %545 = vmatpush3.bf16.msra.mxu0 %v582_v32 }
 0x13e   :  { %v187_v26 = vpop.f32.mrb[0].mxu0 }
 0x13f   :  { %v188_v27 = vadd.f32 %v436_v25, %v187_v26  ;;  %v508_v28 = vpop.f32.mrb[1].mxu0 }
 0x140   :  { %v190_v29 = vpop.f32.mrb[2].mxu0 }
 0x141   :  { %v193_v30 = vpack.c.bf16 %v188_v27, %v188_v27  ;;  %v509_v31 = vpop.f32.mrb[3].mxu0 }
 0x143   :  { %527 = vmatmul.mubr.bf16.vlgmr.msra.gmra.mrb[0].mxu1 %v193_v30 }
 0x216   :  { %v299_v34 = vpop.f32.mrb[0].mxu1 }
 0x217   :  { %v300_v35 = vadd.f32 %v445_v33, %v299_v34  ;;  %v528_v36 = vpop.f32.mrb[1].mxu1 }
 0x218   :  { %v302_v37 = vpop.f32.mrb[2].mxu1 }
 0x219   :  { %v305_v38 = vpack.c.bf16 %v300_v35, %v300_v35  ;;  %v529_v39 = vpop.f32.mrb[3].mxu1 }
 0x21b   :  { %547 = vmatmul.mubr.bf16.vlgmr.msra.gmra.mrb[4].mxu0 %v305_v38 }
 0x2ee   :  { %v411_v41 = vpop.f32.mrb[4].mxu0 }
 0x2ef   :  { %v412_v42 = vadd.f32 %v454_v40, %v411_v41  ;;  %v548_v43 = vpop.f32.mrb[5].mxu0 }
 0x2f0   :  { %v414_v44 = vpop.f32.mrb[6].mxu0 }
 0x2f1   :  { %v417_v45 = vmax.f32 %v412_v42, 0.0  ;;  %v549_v46 = vpop.f32.mrb[7].mxu0 }
 0x2f3   :  { %418 = vst [vmem:[#allocation10] sm:$0xff] %v417_v45 }
 0x2f4   :  { %682 = shalt.err (!%p679_p8)
}
 0x2f5   :  { %s683_s6 = scalar_lea.hbm %s865_s7, 128 }
 0x2f6   :  { %p684_p9 = scmp.ne.s32.totalorder %s865_s7, %s683_s6  ;;  %p687_p10 = scmp.lt.u32.totalorder %s683_s6, %s865_s7 }
 0x2f8   :  { %p689_p11 = pnand %p687_p10, %p684_p9 }
 0x2fa   :  { %692 = shalt.err (!%p689_p11)
}
 0x2fb   :  { %428 = dma.vmem_to_hbm [thread:$0]  %s426_s29, 128, %s865_s7, [#allocation4]  }
 0x2fc   :  { %699 = dma.done.wait [#allocation4], 128  }
 0x2fd   :  { %700 = vsyncadd [#allocation4], 4294967168 }
 0x2fe   :  { %432 = vsyncpa [#allocation3], 1 }
 0x2ff   :  { %433 = vsyncpa [#allocation6], 1 }
 0x300   :  { %434 = vsyncpa [#allocation9], 1 }
 0x301   :  { %435 = vsyncpa [#allocation4], 1 }

</bundles_post_ra>
